<compile_context>
chip_gen: v6e
topology: v6e:2x2x1
jax: 0.10.0
libtpu: 0.0.40
codegen_flags: <defaults>
</compile_context>

<pallas_src>
import math

import jax
import jax.numpy as jnp
from jax.experimental import pallas as pl
from jax.experimental.pallas import tpu as pltpu

_SQRT_2_OVER_PI = math.sqrt(2.0 / math.pi)


def _gelu_tanh(h):
    # torch.nn.GELU(approximate='tanh'); keep the math in f32.
    return 0.5 * h * (1.0 + jnp.tanh(_SQRT_2_OVER_PI * (h + 0.044715 * (h * h * h))))


# --------------------------------------------------------------------------- #
# Kernels
# --------------------------------------------------------------------------- #

def mlp_kernel_flat(x_ref, w1_ref, b1_ref, w2_ref, b2_ref, o_ref):
    """Resident-weight path (whole W1/W2 in VMEM). No accumulator round-trips."""
    h = jnp.dot(x_ref[...], w1_ref[...], preferred_element_type=jnp.float32)
    g = _gelu_tanh(h + b1_ref[...])
    y = jnp.dot(g.astype(w2_ref.dtype), w2_ref[...], preferred_element_type=jnp.float32)
    o_ref[...] = (y + b2_ref[...]).astype(o_ref.dtype)


def mlp_kernel_tiled(x_ref, w1_ref, b1_ref, w2_ref, b2_ref, o_ref, acc_ref):
    """Streamed-weight path. Grid = (row tiles, hidden tiles); the hidden axis
    ("arbitrary", innermost) is the reduction axis of the second matmul."""
    k = pl.program_id(1)
    n_k = pl.num_programs(1)

    # c_fc slice: (tm, E) @ (E, th); f32 accumulation via preferred_element_type.
    h = jnp.dot(x_ref[...], w1_ref[...], preferred_element_type=jnp.float32)
    g = _gelu_tanh(h + b1_ref[...])
    # c_proj partial: (tm, th) @ (th, E)
    part = jnp.dot(g.astype(w2_ref.dtype), w2_ref[...], preferred_element_type=jnp.float32)

    @pl.when(k == 0)
    def _init():                      # fold b2 here: no separate zero-init pass
        acc_ref[...] = part + b2_ref[...]

    @pl.when(jnp.logical_and(k > 0, k < n_k - 1))
    def _accumulate():
        acc_ref[...] += part

    @pl.when(k == n_k - 1)
    def _finalize():                  # last k-step writes straight to the output tile
        o_ref[...] = (acc_ref[...] + part).astype(o_ref.dtype)


# --------------------------------------------------------------------------- #
# Sizing helpers
# --------------------------------------------------------------------------- #

def _round_up(a, b):
    return (a + b - 1) // b * b


def _tpu_vmem_capacity_bytes():
    try:
        info = pltpu.get_tpu_info()
        cap = getattr(info, "vmem_capacity_bytes", None)
        if cap:
            return int(cap)
    except Exception:
        pass
    return 64 << 20  # conservative default: v7x has the smallest VMEM per core


_BUFFERED_OK = None


def _buffered_supported():
    """One-time concrete probe for BlockSpec(pipeline_mode=pl.Buffered(1)).
    Replaces the old broad try/except around the real pallas_call (which could
    mask genuine lowering bugs and never triggered under jit)."""
    global _BUFFERED_OK
    if _BUFFERED_OK is None:
        try:
            def _copy(x_ref, o_ref):
                o_ref[...] = x_ref[...]

            x = jnp.ones((8, 128), jnp.float32)
            out = pl.pallas_call(
                _copy,
                out_shape=jax.ShapeDtypeStruct((16, 128), jnp.float32),
                grid=(2,),
                in_specs=[pl.BlockSpec((8, 128), lambda i: (0, 0),
                                       pipeline_mode=pl.Buffered(1))],
                out_specs=pl.BlockSpec((8, 128), lambda i: (i, 0)),
            )(x)
            out = jax.block_until_ready(out)
            _BUFFERED_OK = bool(jnp.all(out == 1.0))
        except Exception:
            _BUFFERED_OK = False
    return _BUFFERED_OK


def _auto_tiles(M, E, H, *, x_it, w_it, o_it, budget, w_res_bufs, tm=None, th=None):
    """Pick (tm, th). th == H means the flat (fully-resident-weight) path."""
    Mr = _round_up(max(M, 1), 8)
    if tm is None:
        tm_cands = list(dict.fromkeys(min(c, Mr) for c in (1024, 768, 512, 384, 256, 128)))
    else:
        tm_cands = [min(tm, Mr)]
    overhead = 4 << 20

    def est(tm_, th_):
        xo = 2 * tm_ * E * (x_it + o_it)            # double-buffered x & out tiles
        hid = tm_ * th_ * (8 + w_it)                # f32 h, f32 g, cast copy of g
        if th_ == H:                                # resident weights, no accumulator
            w = (2 * E * H + H + E) * w_it * w_res_bufs
            return w + xo + hid + overhead
        # streamed W1 slab + W2 slab + b1 (double-buffered) + resident b2, plus f32 acc
        w = 2 * (2 * E * th_ + th_) * w_it + E * w_it * w_res_bufs
        return w + xo + hid + tm_ * E * 4 + overhead

    if th is not None:
        th_cands = [th]
    else:
        th_cands = [H]
        if H % 128 == 0:
            th_cands += [t for t in range(H - 128, 0, -128) if H % t == 0]

    chosen = None
    # 1) Resident-weight path preferred whenever it fits: weights hit HBM once total.
    if th_cands[0] == H:
        for tm_ in tm_cands:
            if est(tm_, H) <= budget:
                chosen = (tm_, H)
                break
    # 2) Streamed path: arithmetic intensity vs weight DMA scales with tm, so
    #    maximize tm first (roofline knob), then th (DMA granularity / fewer steps).
    if chosen is None:
        for tm_ in tm_cands:
            for th_ in th_cands:
                if th_ != H and est(tm_, th_) <= budget:
                    chosen = (tm_, th_)
                    break
            if chosen is not None:
                break
    if chosen is None:
        chosen = (tm_cands[-1], th_cands[-1])
    tm_sel, th_sel = chosen

    # Megacore: v7x shards the "parallel" row axis across 2 TensorCores -> make
    # sure there are >= 2 row tiles when there are enough rows. Cheap on 1-TC chips.
    if tm is None and M >= 256:
        while _round_up(M, tm_sel) // tm_sel < 2 and tm_sel > 128:
            tm_sel = max(128, tm_sel // 2)
    return tm_sel, th_sel


# --------------------------------------------------------------------------- #
# pallas_call wrappers
# --------------------------------------------------------------------------- #

def _flat_call(x2d, w1, b1_2d, w2, b2_2d, *, tm, vmem_limit, resident_single):
    Mp, E = x2d.shape
    H = w1.shape[1]

    def const_spec(shape):
        if resident_single:
            return pl.BlockSpec(shape, lambda i: (0,) * len(shape),
                                pipeline_mode=pl.Buffered(1))
        return pl.BlockSpec(shape, lambda i: (0,) * len(shape))

    return pl.pallas_call(
        mlp_kernel_flat,
        out_shape=jax.ShapeDtypeStruct((Mp, E), x2d.dtype),
        grid_spec=pltpu.PrefetchScalarGridSpec(
            num_scalar_prefetch=0,
            grid=(Mp // tm,),
            in_specs=[
                pl.BlockSpec((tm, E), lambda i: (i, 0)),   # x rows
                const_spec((E, H)),                        # W1 (resident)
                const_spec((1, H)),                        # b1 (resident)
                const_spec((H, E)),                        # W2 (resident)
                const_spec((1, E)),                        # b2 (resident)
            ],
            out_specs=pl.BlockSpec((tm, E), lambda i: (i, 0)),
        ),
        compiler_params=pltpu.CompilerParams(
            dimension_semantics=("parallel",),
            vmem_limit_bytes=vmem_limit,
        ),
    )(x2d, w1, b1_2d, w2, b2_2d)


def _tiled_call(x2d, w1_slabs, b1_2d, w2, b2_2d, *, tm, th, vmem_limit, resident_single):
    Mp, E = x2d.shape
    n_k = w1_slabs.shape[0]
    assert n_k >= 2

    if resident_single:
        b2_spec = pl.BlockSpec((1, E), lambda i, k: (0, 0), pipeline_mode=pl.Buffered(1))
    else:
        b2_spec = pl.BlockSpec((1, E), lambda i, k: (0, 0))

    return pl.pallas_call(
        mlp_kernel_tiled,
        out_shape=jax.ShapeDtypeStruct((Mp, E), x2d.dtype),
        grid_spec=pltpu.PrefetchScalarGridSpec(
            num_scalar_prefetch=0,
            grid=(Mp // tm, n_k),
            in_specs=[
                pl.BlockSpec((tm, E), lambda i, k: (i, 0)),          # x rows
                pl.BlockSpec((None, E, th), lambda i, k: (k, 0, 0)),  # W1 slab (contiguous)
                pl.BlockSpec((1, th), lambda i, k: (0, k)),           # b1 tile
                pl.BlockSpec((th, E), lambda i, k: (k, 0)),           # W2 row tile
                b2_spec,                                              # b2 (resident)
            ],
            out_specs=pl.BlockSpec((tm, E), lambda i, k: (i, 0)),     # constant over k
            scratch_shapes=[pltpu.VMEM((tm, E), jnp.float32)],
        ),
        compiler_params=pltpu.CompilerParams(
            dimension_semantics=("parallel", "arbitrary"),
            vmem_limit_bytes=vmem_limit,
        ),
    )(x2d, w1_slabs, b1_2d, w2, b2_2d)


def mlp_forward(x, w1, b1, w2, b2, *, tm=None, th=None, param_dtype=None):
    """x: (B, T, E) -> (B, T, E). Fused c_fc -> GELU(tanh) -> c_proj.

    param_dtype: optionally downcast weights/biases (e.g. jnp.bfloat16) before the
    kernel; f32 accumulation is preserved via preferred_element_type.
    """
    B, T, E = x.shape
    H = w1.shape[1]
    assert w1.shape == (E, H) and w2.shape == (H, E)
    M = B * T

    if param_dtype is not None:
        w1, b1, w2, b2 = (a.astype(param_dtype) for a in (w1, b1, w2, b2))

    resident_single = _buffered_supported()
    budget = int(0.85 * _tpu_vmem_capacity_bytes())
    tm_sel, th_sel = _auto_tiles(
        M, E, H,
        x_it=x.dtype.itemsize, w_it=w1.dtype.itemsize, o_it=x.dtype.itemsize,
        budget=budget, w_res_bufs=(1 if resident_single else 2), tm=tm, th=th)
    assert H % th_sel == 0, "hidden tile must divide 4*n_embed"

    Mp = _round_up(M, tm_sel)
    x2d = x.reshape(M, E)
    if Mp != M:
        x2d = jnp.pad(x2d, ((0, Mp - M), (0, 0)))  # ragged rows: pad, slice after
    b1_2d = b1.reshape(1, H)
    b2_2d = b2.reshape(1, E)

    vmem_limit = int(min(budget, 128 << 20))

    if th_sel == H:
        out2d = _flat_call(x2d, w1, b1_2d, w2, b2_2d, tm=tm_sel,
                           vmem_limit=vmem_limit, resident_single=resident_single)
    else:
        n_k = H // th_sel
        # Contiguous (n_k, E, th) slabs -> full-rate DMA for the streamed W1 tiles.
        w1_slabs = w1.reshape(E, n_k, th_sel).transpose(1, 0, 2)
        out2d = _tiled_call(x2d, w1_slabs, b1_2d, w2, b2_2d, tm=tm_sel, th=th_sel,
                            vmem_limit=vmem_limit, resident_single=resident_single)

    return out2d[:M].reshape(B, T, E)


def mlp_reference(x, w1, b1, w2, b2):
    h = jnp.einsum("bte,eh->bth", x, w1) + b1
    g = _gelu_tanh(h)
    return jnp.einsum("bth,he->bte", g, w2) + b2


if __name__ == "__main__":
    def init(key, B, T, E):
        H = 4 * E
        kx, k1, k2, k3, k4 = jax.random.split(key, 5)
        x = jax.random.normal(kx, (B, T, E), dtype=jnp.float32)
        w1 = jax.random.uniform(k1, (E, H), jnp.float32, -1.0, 1.0) / math.sqrt(E)
        b1 = jax.random.uniform(k2, (H,), jnp.float32, -1.0, 1.0) / math.sqrt(E)
        w2 = jax.random.uniform(k3, (H, E), jnp.float32, -1.0, 1.0) / math.sqrt(H)
        b2 = jax.random.uniform(k4, (E,), jnp.float32, -1.0, 1.0) / math.sqrt(H)
        return x, w1, b1, w2, b2

    # 1) f32, small GPT-2-style config: n_embed=32, hidden=128, batch=2, seq=8 (flat path)
    x, w1, b1, w2, b2 = init(jax.random.PRNGKey(0), 2, 8, 32)
    out = jax.block_until_ready(mlp_forward(x, w1, b1, w2, b2))
    ref = mlp_reference(x, w1, b1, w2, b2)
    assert out.shape == x.shape
    assert jnp.allclose(out, ref, atol=1e-5, rtol=1e-5), "f32 mismatch vs reference"

    # 2) hidden-dim streaming path: n_embed=64 -> H=256, th=128 (2 k-steps)
    x, w1, b1, w2, b2 = init(jax.random.PRNGKey(1), 2, 8, 64)
    out_flat = jax.block_until_ready(mlp_forward(x, w1, b1, w2, b2, th=256))
    out_tiled = jax.block_until_ready(mlp_forward(x, w1, b1, w2, b2, th=128))
    ref = mlp_reference(x, w1, b1, w2, b2)
    assert jnp.allclose(out_tiled, out_flat, atol=1e-5, rtol=1e-5), "H-tiling mismatch"
    assert jnp.allclose(out_tiled, ref, atol=3e-2, rtol=3e-2), "tiled mismatch vs reference"

    # 3) bf16 operands (native MXU dtype; f32 accumulation stays inside the kernel)
    x, w1, b1, w2, b2 = init(jax.random.PRNGKey(0), 2, 8, 32)
    out_bf = jax.block_until_ready(
        mlp_forward(x.astype(jnp.bfloat16), w1, b1, w2, b2, param_dtype=jnp.bfloat16))
    ref = mlp_reference(x, w1, b1, w2, b2)
    assert out_bf.dtype == jnp.bfloat16
    assert jnp.allclose(out_bf.astype(jnp.float32), ref, atol=5e-2, rtol=5e-2), \
        "bf16 mismatch vs f32 reference"

    print("KERNEL_OK")
</pallas_src>

<mosaic_0001>
module attributes {stable_mosaic.version = 11 : i64} {
  func.func @_copy(%arg0: i32, %arg1: memref<8x128xf32, #tpu.memory_space<vmem>>, %arg2: memref<8x128xf32, #tpu.memory_space<vmem>>) attributes {dimension_semantics = [#tpu.dimension_semantics<arbitrary>], iteration_bounds = array<i64: 2>, scalar_prefetch = 0 : i64, scratch_operands = 0 : i64, tpu.core_type = #tpu.core_type<tc>, window_params = [{pipeline_mode = #tpu.pipeline_mode<synchronous>, transform_indices = @transform_0, window_bounds = array<i64: 8, 128>}, {transform_indices = @transform_1, window_bounds = array<i64: 8, 128>}]} {
    %c0 = arith.constant 0 : index
    %c0_0 = arith.constant 0 : index
    %0 = vector.load %arg1[%c0, %c0_0] : memref<8x128xf32, #tpu.memory_space<vmem>>, vector<8x128xf32>
    %c0_1 = arith.constant 0 : index
    %c0_2 = arith.constant 0 : index
    %1 = vector.load %arg2[%c0_1, %c0_2] : memref<8x128xf32, #tpu.memory_space<vmem>>, vector<8x128xf32>
    tpu.vector_store %arg2[%c0_1, %c0_2], %0 {strides = array<i32>} : memref<8x128xf32, #tpu.memory_space<vmem>>, vector<8x128xf32>,
    return
  }
  func.func @transform_0(%arg0: i32) -> (i32, i32) {
    %c0_i32 = arith.constant 0 : i32
    %c0_i32_0 = arith.constant 0 : i32
    %c0_i32_1 = arith.constant 0 : i32
    return %c0_i32, %c0_i32_0 : i32, i32
  }
  func.func @transform_1(%arg0: i32) -> (i32, i32) {
    %c0_i32 = arith.constant 0 : i32
    %c0_i32_0 = arith.constant 0 : i32
    return %arg0, %c0_i32 : i32, i32
  }
}

module attributes {stable_mosaic.version = 11 : i64} {
  func.func @mlp_kernel_flat(%arg0: i32, %arg1: memref<16x32xf32, #tpu.memory_space<vmem>>, %arg2: memref<32x128xf32, #tpu.memory_space<vmem>>, %arg3: memref<1x128xf32, #tpu.memory_space<vmem>>, %arg4: memref<128x32xf32, #tpu.memory_space<vmem>>, %arg5: memref<1x32xf32, #tpu.memory_space<vmem>>, %arg6: memref<16x32xf32, #tpu.memory_space<vmem>>) attributes {dimension_semantics = [#tpu.dimension_semantics<parallel>], iteration_bounds = array<i64: 1>, scalar_prefetch = 0 : i64, scratch_operands = 0 : i64, tpu.core_type = #tpu.core_type<tc>, window_params = [{transform_indices = @transform_0, window_bounds = array<i64: 16, 32>}, {pipeline_mode = #tpu.pipeline_mode<synchronous>, transform_indices = @transform_1, window_bounds = array<i64: 32, 128>}, {pipeline_mode = #tpu.pipeline_mode<synchronous>, transform_indices = @transform_2, window_bounds = array<i64: 1, 128>}, {pipeline_mode = #tpu.pipeline_mode<synchronous>, transform_indices = @transform_3, window_bounds = array<i64: 128, 32>}, {pipeline_mode = #tpu.pipeline_mode<synchronous>, transform_indices = @transform_4, window_bounds = array<i64: 1, 32>}, {transform_indices = @transform_5, window_bounds = array<i64: 16, 32>}]} {
    %c0 = arith.constant 0 : index
    %c0_0 = arith.constant 0 : index
    %0 = vector.load %arg1[%c0, %c0_0] : memref<16x32xf32, #tpu.memory_space<vmem>>, vector<16x32xf32>
    %c0_1 = arith.constant 0 : index
    %c0_2 = arith.constant 0 : index
    %1 = vector.load %arg2[%c0_1, %c0_2] : memref<32x128xf32, #tpu.memory_space<vmem>>, vector<32x128xf32>
    %cst = arith.constant dense<0.000000e+00> : vector<16x128xf32>
    %2 = tpu.matmul %0, %1, %cst {dimension_numbers = #tpu.dot_dimension_numbers<[1], [0], [0], [1], [0, 0, 1, 1], [], []>} : vector<16x32xf32>, vector<32x128xf32>, vector<16x128xf32> -> vector<16x128xf32>
    %c0_3 = arith.constant 0 : index
    %c0_4 = arith.constant 0 : index
    %3 = vector.load %arg3[%c0_3, %c0_4] : memref<1x128xf32, #tpu.memory_space<vmem>>, vector<1x128xf32>
    %4 = vector.broadcast %3 : vector<1x128xf32> to vector<16x128xf32>
    %5 = arith.addf %2, %4 : vector<16x128xf32>
    %cst_5 = arith.constant 5.000000e-01 : f32
    %6 = vector.broadcast %cst_5 : f32 to vector<16x128xf32>
    %7 = arith.mulf %6, %5 : vector<16x128xf32>
    %8 = arith.mulf %5, %5 : vector<16x128xf32>
    %9 = arith.mulf %8, %5 : vector<16x128xf32>
    %cst_6 = arith.constant 4.471500e-02 : f32
    %10 = vector.broadcast %cst_6 : f32 to vector<16x128xf32>
    %11 = arith.mulf %10, %9 : vector<16x128xf32>
    %12 = arith.addf %5, %11 : vector<16x128xf32>
    %cst_7 = arith.constant 0.797884583 : f32
    %13 = vector.broadcast %cst_7 : f32 to vector<16x128xf32>
    %14 = arith.mulf %13, %12 : vector<16x128xf32>
    %15 = math.tanh %14 : vector<16x128xf32>
    %cst_8 = arith.constant 1.000000e+00 : f32
    %16 = vector.broadcast %cst_8 : f32 to vector<16x128xf32>
    %17 = arith.addf %16, %15 : vector<16x128xf32>
    %18 = arith.mulf %7, %17 : vector<16x128xf32>
    %c0_9 = arith.constant 0 : index
    %c0_10 = arith.constant 0 : index
    %19 = vector.load %arg4[%c0_9, %c0_10] : memref<128x32xf32, #tpu.memory_space<vmem>>, vector<128x32xf32>
    %cst_11 = arith.constant dense<0.000000e+00> : vector<16x32xf32>
    %20 = tpu.matmul %18, %19, %cst_11 {dimension_numbers = #tpu.dot_dimension_numbers<[1], [0], [0], [1], [0, 0, 1, 1], [], []>} : vector<16x128xf32>, vector<128x32xf32>, vector<16x32xf32> -> vector<16x32xf32>
    %c0_12 = arith.constant 0 : index
    %c0_13 = arith.constant 0 : index
    %21 = vector.load %arg5[%c0_12, %c0_13] : memref<1x32xf32, #tpu.memory_space<vmem>>, vector<1x32xf32>
    %22 = vector.broadcast %21 : vector<1x32xf32> to vector<16x32xf32>
    %23 = arith.addf %20, %22 : vector<16x32xf32>
    %c0_14 = arith.constant 0 : index
    %c0_15 = arith.constant 0 : index
    %24 = vector.load %arg6[%c0_14, %c0_15] : memref<16x32xf32, #tpu.memory_space<vmem>>, vector<16x32xf32>
    tpu.vector_store %arg6[%c0_14, %c0_15], %23 {strides = array<i32>} : memref<16x32xf32, #tpu.memory_space<vmem>>, vector<16x32xf32>,
    return
  }
  func.func @transform_0(%arg0: i32) -> (i32, i32) {
    %c0_i32 = arith.constant 0 : i32
    %c0_i32_0 = arith.constant 0 : i32
    return %arg0, %c0_i32 : i32, i32
  }
  func.func @transform_1(%arg0: i32) -> (i32, i32) {
    %c0_i32 = arith.constant 0 : i32
    %c0_i32_0 = arith.constant 0 : i32
    %c0_i32_1 = arith.constant 0 : i32
    return %c0_i32, %c0_i32_0 : i32, i32
  }
  func.func @transform_2(%arg0: i32) -> (i32, i32) {
    %c0_i32 = arith.constant 0 : i32
    %c0_i32_0 = arith.constant 0 : i32
    %c0_i32_1 = arith.constant 0 : i32
    return %c0_i32, %c0_i32_0 : i32, i32
  }
  func.func @transform_3(%arg0: i32) -> (i32, i32) {
    %c0_i32 = arith.constant 0 : i32
    %c0_i32_0 = arith.constant 0 : i32
    %c0_i32_1 = arith.constant 0 : i32
    return %c0_i32, %c0_i32_0 : i32, i32
  }
  func.func @transform_4(%arg0: i32) -> (i32, i32) {
    %c0_i32 = arith.constant 0 : i32
    %c0_i32_0 = arith.constant 0 : i32
    %c0_i32_1 = arith.constant 0 : i32
    return %c0_i32, %c0_i32_0 : i32, i32
  }
  func.func @transform_5(%arg0: i32) -> (i32, i32) {
    %c0_i32 = arith.constant 0 : i32
    %c0_i32_0 = arith.constant 0 : i32
    return %arg0, %c0_i32 : i32, i32
  }
}

</mosaic_0001>

<bundles_post_ra>
// kernel: tpu_custom_call.1
= control target key start
LH: loop header
LB: loop body
LE: loop exit
PB: predicated region body
PF: predicated region fallthrough
CT: control target
= control target key end

     0   :  { %6 = vsyncpa [#allocation3], 0  ;;  %s453_s0 = inlined_call_operand.hbm [shape: f32[8,128], index: 0, kind: input, shape index: {}]   ;;  %s454_s1 = inlined_call_operand.hbm [shape: f32[16,128], index: 1, kind: output, shape index: {}]  }
   0x1   :  { %7 = vsyncpa [#allocation4], 0 }
   0x2   :  { %9 = vsyncpa [#allocation4 + $0x1], 0  ;;  %s347_s6 = smov 0   ;;  %s349_s7 = smov 0  }
   0x3   :  { %s351_s8 = smov 0   ;;  %s353_s9 = smov 0  }
   0x4 LB: > { %s368_s10 = sadd.s32 4294967295, %s333_s9   ;;  %s183_s11 = sadd.s32 4294967294, %s333_s9   ;;  %s333_s9 = sphi %s353_s9, %s462_s9   ;;  %s329_s8 = sphi %s351_s8, %s461_s8   ;;  %s325_s7 = sphi %s349_s7, %s460_s7   ;;  %s321_s6 = sphi %s347_s6, %s459_s6  }
   0x5   : > { %s372_s12 = sadd.s32 1, %s333_s9   ;;  %s43_s13 = sadd.s32 1, %s329_s8 }
   0x6   : > { %s40_s14 = ssub.s32 %s333_s9, %s372_s12  ;;  %p53_p0 = scmp.ne.s32.totalorder %s329_s8, %s325_s7 }
   0x7   : > { %p41_p1 = scmp.eq.s32.totalorder %s40_s14, 0  ;;  %p54_p2 = scmp.eq.s32.totalorder %s368_s10, 1 }
   0x8   : > { %p59_p3 = scmp.ne.s32.totalorder %s325_s7, %s321_s6  ;;  %p60_p4 = scmp.eq.s32.totalorder %s183_s11, 1 }
   0x9   : > { %s383_s15 = scalar_select %p41_p1, %s329_s8, %s43_s13  }
   0xa   : > { %p385_p5 = por %p54_p2, %p53_p0  ;;  %p389_p6 = por %p60_p4, %p59_p3 }
   0xb   : > { %p184_p7 = scmp.ge.s32.totalorder %s333_s9, 1  ;;  %p67_p8 = scmp.lt.s32.totalorder %s333_s9, 3 }
   0xc   : > { %s456_s17 = scalar_select %p389_p6, 1, 0 }
   0xd   : > { %p207_p9 = scmp.eq.s32.totalorder %s368_s10, 0  ;;  %p396_p10 = pnand %p184_p7, %p67_p8 }
   0xe   : > { %s335_s19 = smov [#allocation2]  }
   0xf   : > { %s80_s20 = sshll.u32 %s335_s19, 4  ;;  %p199_p11 = pneg %p396_p10  ;;  %s81_s20 = int_to_ptr.vmem [resolvable:$true] %s80_s20 }
  0x10   : > { %s254_s21 = scalar_lea.vmem %s81_s20, 128  ;;  %p262_p3 = scmp.lt.s32.totalorder %s81_s20, %s81_s20 }
  0x11   : > { %p200_p12 = pnand %p207_p9, %p199_p11  ;;  %p255_p0 = scmp.ne.s32.totalorder %s81_s20, %s254_s21 }
  0x12   : > { %p263_p4 = scmp.lt.s32.totalorder %s254_s21, %s254_s21 }
  0x13   : > { %p245_p13 = pneg %p200_p12 }
  0x14   : > { %p264_p6 = por %p263_p4, %p262_p3 }
  0x15   : > { %p257_p1 = pnand %p255_p0, %p245_p13 }
  0x17   : > { %p258_p2 = pneg %p257_p1 }
  0x19   : > { %p265_p7 = pnand %p264_p6, %p258_p2 }
  0x1b   : > { %268 = shalt.err (!%p265_p7)
}
  0x1c   : > { %202 = dma.hbm_to_vmem [thread:$0]  (!%p200_p12), %s453_s0, 128, %s81_s20, [#allocation3]  }
  0x1d   : > { %93 = sbr.rel (%p396_p10) target bundleno = 60 (0x3c), region = 24 }
  0x22   : > { %312 = dma.done.wait (%p207_p9), [#allocation3], 128  }
  0x23   : > { %314 = vsyncadd (%p207_p9), [#allocation3], 4294967168  ;;  %s105_s24 = sand.u32 1, %s325_s7   ;;  %s190_s28 = sshll.u32 %s368_s10, 7  ;;  %v108_v0 = vld [vmem:[#allocation2] sm:$0xff] }
  0x24   : > { %s188_s25 = sshll.u32 %s105_s24, 3  ;;  %s122_s2 = scalar_lea.hbm %s454_s1, %s190_s28 }
  0x25   : > { %s107_s26 = scalar_lea.vmem [#allocation5], %s188_s25  ;;  %s111_s3 = scalar_lea.sflag [#allocation4], %s105_s24 }
  0x26   : > { %s124_s27 = sshll.u32 %s107_s26, 4  ;;  %109 = vst [vmem:[%s107_s26] sm:$0xff] %v108_v0  ;;  %s336_s5 = smov [#allocation5]   ;;  %s415_s27 = int_to_ptr.vmem [resolvable:$true] %s124_s27 }
  0x27   : > { %s269_s4 = scalar_lea.vmem %s415_s27, 128  ;;  %s273_s11 = sshll.u32 %s336_s5, 4  ;;  %s274_s11 = int_to_ptr.vmem [resolvable:$false] %s273_s11 }
  0x28   : > { %p270_p6 = scmp.ne.s32.totalorder %s415_s27, %s269_s4  ;;  %s275_s10 = scalar_lea.vmem %s274_s11, 256 }
  0x29   : > { %p276_p10 = scmp.lt.s32.totalorder %s415_s27, %s274_s11  ;;  %p277_p11 = scmp.lt.s32.totalorder %s275_s10, %s269_s4 }
  0x2a   : > { %p271_p8 = pnand %p270_p6, %p385_p5 }
  0x2b   : > { %p278_p12 = por %p277_p11, %p276_p10 }
  0x2c   : > { %p272_p9 = pneg %p271_p8 }
  0x2e   : > { %p279_p13 = pnand %p278_p12, %p272_p9 }
  0x30   : > { %282 = shalt.err (!%p279_p13)
}
  0x31   : > { %s283_s13 = scalar_lea.hbm %s122_s2, 128  ;;  %s287_s19 = scalar_lea.hbm %s454_s1, 256 }
  0x32   : > { %p284_p0 = scmp.ne.s32.totalorder %s122_s2, %s283_s13  ;;  %p288_p3 = scmp.lt.s32.totalorder %s122_s2, %s454_s1 }
  0x33   : > { %p289_p4 = scmp.lt.s32.totalorder %s287_s19, %s283_s13 }
  0x34   : > { %p285_p1 = pnand %p284_p0, %p385_p5 }
  0x35   : > { %p290_p7 = por %p289_p4, %p288_p3 }
  0x36   : > { %p286_p2 = pneg %p285_p1 }
  0x38   : > { %p291_p6 = pnand %p290_p7, %p286_p2 }
  0x3a   : > { %294 = shalt.err (!%p291_p6)
}
  0x3b   : > { %197 = dma.vmem_to_hbm [thread:$0]  (%p385_p5), %s415_s27, 128, %s122_s2, %s111_s3  }
  0x3c PF: > { %p209_p8 = scmp.ge.s32.totalorder %s333_s9, 2  ;;  %s136_s22 = sand.u32 1, %s321_s6  }
  0x3d   : > { %p458_p9 = scmp.ne.s32.totalorder %s456_s17, 0  ;;  %s137_s23 = scalar_lea.sflag [#allocation4], %s136_s22 }
  0x3f   : > { %p204_p10 = pnand %p209_p8, %p458_p9 }
  0x41   : > { %p205_p11 = pneg %p204_p10 }
  0x43   : > { %316 = dma.done.wait (%p205_p11), %s137_s23, 128  }
  0x44   : > { %318 = vsyncadd (%p205_p11), %s137_s23, 4294967168  ;;  %p12_p12 = scmp.ge.s32.totalorder %s372_s12, 4   ;;  %s459_s6 = smov %s325_s7 }
  0x45   : > { %s460_s7 = smov %s329_s8  ;;  %s461_s8 = smov %s383_s15 }
  0x46   : > { %s462_s9 = smov %s372_s12  ;;  %14 = sbr.rel (!%p12_p12) target bundleno = 4 (0x4), region = 61 }
  0x4b   :  { %142 = vsyncpa [#allocation3], 1 }
  0x4c   :  { %144 = vsyncpa [#allocation3 + $0x1], 1 }
  0x4d   :  { %145 = vsyncpa [#allocation4], 1 }
  0x4e   :  { %147 = vsyncpa [#allocation4 + $0x1], 1 }

// kernel: tpu_custom_call.1
= control target key start
LH: loop header
LB: loop body
LE: loop exit
PB: predicated region body
PF: predicated region fallthrough
CT: control target
= control target key end

     0   :  { %vm34_vm0 = vcmask 261120   ;;  %s465_s0 = inlined_call_operand.vmem [shape: f32[16,32], index: 0, kind: input, shape index: {}]   ;;  %s466_s1 = inlined_call_operand.vmem [shape: f32[32,128], index: 1, kind: input, shape index: {}]   ;;  %s467_s2 = inlined_call_operand.vmem [shape: f32[1,128], index: 2, kind: input, shape index: {}]   ;;  %s468_s3 = inlined_call_operand.vmem [shape: f32[128,32], index: 3, kind: input, shape index: {}]   ;;  %s469_s4 = inlined_call_operand.vmem [shape: f32[1,32], index: 4, kind: input, shape index: {}]   ;;  %s470_s5 = inlined_call_operand.hbm [shape: f32[16,32], index: 5, kind: output, shape index: {}]  }
   0x1   :  { %v26_v0 = vld [vmem:[%s466_s1 + $0x18] sm:$0xff]  ;;  %v25_v1 = vld [vmem:[%s466_s1 + $0x10] sm:$0xff]  ;;  %v21_v2 = vld [vmem:[%s465_s0] sm:$0xff] }
   0x2   :  { %278 = vmatprep.subr.mxu0 %v26_v0  ;;  %v24_v3 = vld [vmem:[%s466_s1 + $0x8] sm:$0xff]  ;;  %286 = vmatprep.mubr.msk.f32.mxu0 %vm34_vm0, %v21_v2 }
   0x3   :  { %279 = vmatpush3.msra.mxu0 %v26_v0 }
   0x4   :  { %10 = vsyncpa [#allocation3], 0  ;;  %280 = vmatprep.subr.mxu0 %v25_v1  ;;  %v23_v4 = vld [vmem:[%s466_s1] sm:$0xff]  ;;  %v22_v5 = vld [vmem:[%s465_s0 + $0x8] sm:$0xff]  ;;  %s353_s10 = smov [#allocation2]  }
   0x5   :  { %281 = vmatpush3.msra.mxu0 %v25_v1  ;;  %v149_v6 = vld [vmem:[%s468_s3 + $0x78] sm:$0xff]  ;;  %v148_v7 = vld [vmem:[%s468_s3 + $0x70] sm:$0xff]  ;;  %v147_v8 = vld [vmem:[%s468_s3 + $0x68] sm:$0xff]  ;;  %s239_s11 = sshll.u32 %s353_s10, 4  ;;  %s240_s11 = int_to_ptr.vmem [resolvable:$true] %s239_s11 }
   0x6   :  { %282 = vmatprep.subr.mxu0 %v24_v3  ;;  %289 = vmatprep.subr.mxu1 %v149_v6  ;;  %v146_v9 = vld [vmem:[%s468_s3 + $0x60] sm:$0xff]  ;;  %v145_v10 = vld [vmem:[%s468_s3 + $0x58] sm:$0xff]  ;;  %v144_v11 = vld [vmem:[%s468_s3 + $0x50] sm:$0xff]  ;;  %s331_s12 = scalar_lea.vmem %s240_s11, 256  ;;  %p336_p1 = scmp.lt.s32.totalorder %s240_s11, %s240_s11 }
   0x7   :  { %283 = vmatpush3.msra.mxu0 %v24_v3  ;;  %290 = vmatpush3.msra.mxu1 %v149_v6  ;;  %v143_v12 = vld [vmem:[%s468_s3 + $0x48] sm:$0xff]  ;;  %v142_v13 = vld [vmem:[%s468_s3 + $0x40] sm:$0xff]  ;;  %v141_v14 = vld [vmem:[%s468_s3 + $0x38] sm:$0xff]  ;;  %p332_p0 = scmp.ne.s32.totalorder %s240_s11, %s331_s12  ;;  %p337_p2 = scmp.lt.s32.totalorder %s331_s12, %s331_s12 }
   0x8   :  { %284 = vmatprep.subr.mxu0 %v23_v4  ;;  %291 = vmatprep.subr.mxu1 %v148_v7  ;;  %v140_v15 = vld [vmem:[%s468_s3 + $0x30] sm:$0xff]  ;;  %v139_v16 = vld [vmem:[%s468_s3 + $0x28] sm:$0xff]  ;;  %v138_v17 = vld [vmem:[%s468_s3 + $0x20] sm:$0xff] }
   0x9   :  { %285 = vmatpush3.msra.mxu0 %v23_v4  ;;  %292 = vmatpush3.msra.mxu1 %v148_v7  ;;  %v137_v18 = vld [vmem:[%s468_s3 + $0x18] sm:$0xff]  ;;  %v136_v19 = vld [vmem:[%s468_s3 + $0x10] sm:$0xff]  ;;  %v135_v20 = vld [vmem:[%s468_s3 + $0x8] sm:$0xff]  ;;  %p338_p3 = por %p337_p2, %p336_p1 }
   0xa   :  { %287 = vmatmul.mubr.msk.f32.vlgmr.msra.gmra.mxu0 %vm34_vm0, %v22_v5  ;;  %293 = vmatprep.subr.mxu1 %v147_v8  ;;  %v134_v21 = vld [vmem:[%s468_s3] sm:$0xff] }
   0xb   :  { %294 = vmatpush3.msra.mxu1 %v147_v8  ;;  %v250_v22 = vld [vmem:[%s467_s2] ss:$0 sm:$0xff]  ;;  %p339_p4 = pnand %p338_p3, %p332_p0 }
   0xc   :  { %295 = vmatprep.subr.mxu1 %v146_v9  ;;  %v253_v45 = vld [vmem:[%s469_s4] ss:$0 sm:$0xff] }
   0xd   :  { %296 = vmatpush3.msra.mxu1 %v146_v9 }
   0xe   :  { %297 = vmatprep.subr.mxu1 %v145_v10 }
   0xf   :  { %298 = vmatpush3.msra.mxu1 %v145_v10 }
  0x10   :  { %299 = vmatprep.subr.mxu1 %v144_v11 }
  0x11   :  { %300 = vmatpush3.msra.mxu1 %v144_v11 }
  0x12   :  { %301 = vmatprep.subr.mxu1 %v143_v12 }
  0x13   :  { %302 = vmatpush3.msra.mxu1 %v143_v12 }
  0x14   :  { %303 = vmatprep.subr.mxu1 %v142_v13 }
  0x15   :  { %304 = vmatpush3.msra.mxu1 %v142_v13 }
  0x16   :  { %305 = vmatprep.subr.mxu1 %v141_v14 }
  0x17   :  { %306 = vmatpush3.msra.mxu1 %v141_v14 }
  0x18   :  { %307 = vmatprep.subr.mxu1 %v140_v15 }
  0x19   :  { %308 = vmatpush3.msra.mxu1 %v140_v15 }
  0x1a   :  { %309 = vmatprep.subr.mxu1 %v139_v16 }
  0x1b   :  { %310 = vmatpush3.msra.mxu1 %v139_v16 }
  0x1c   :  { %311 = vmatprep.subr.mxu1 %v138_v17 }
  0x1d   :  { %312 = vmatpush3.msra.mxu1 %v138_v17 }
  0x1e   :  { %313 = vmatprep.subr.mxu1 %v137_v18 }
  0x1f   :  { %314 = vmatpush3.msra.mxu1 %v137_v18 }
  0x20   :  { %315 = vmatprep.subr.mxu1 %v136_v19 }
  0x21   :  { %316 = vmatpush3.msra.mxu1 %v136_v19 }
  0x22   :  { %317 = vmatprep.subr.mxu1 %v135_v20 }
  0x23   :  { %318 = vmatpush3.msra.mxu1 %v135_v20 }
  0x24   :  { %319 = vmatprep.subr.mxu1 %v134_v21 }
  0x25   :  { %320 = vmatpush3.msra.mxu1 %v134_v21 }
  0xca   :  { %v288_v23 = vpop.f32.mrf.mxu0 }
  0xcb   :  { %v113_v24 = vadd.f32 %v288_v23, %v250_v22 }
  0xcc   :  { %v107_v25 = vpop.f32.mrf.mxu0 }
  0xcd   :  { %v119_v26 = vmul.f32 %v113_v24, %v113_v24  ;;  %v108_v27 = vadd.f32 %v250_v22, %v107_v25  ;;  %v117_v42 = vmul.f32 0.5, %v113_v24 }
  0xcf   :  { %v121_v28 = vmul.f32 %v119_v26, %v113_v24  ;;  %v118_v29 = vmul.f32 %v108_v27, %v108_v27  ;;  %v116_v40 = vmul.f32 0.5, %v108_v27 }
  0xd1   :  { %v123_v30 = vmul.f32 0.044715, %v121_v28  ;;  %v120_v31 = vmul.f32 %v118_v29, %v108_v27 }
  0xd3   :  { %v125_v32 = vadd.f32 %v123_v30, %v113_v24  ;;  %v122_v33 = vmul.f32 0.044715, %v120_v31 }
  0xd5   :  { %v127_v34 = vmul.f32 0.7978846, %v125_v32  ;;  %v124_v35 = vadd.f32 %v122_v33, %v108_v27 }
  0xd7   :  { %v126_v36 = vmul.f32 0.7978846, %v124_v35  ;;  %327 = vtanh.f32 %v127_v34 }
  0xd9   :  { %329 = vtanh.f32 %v126_v36 }
  0xe4   :  { %v328_v37 = vpop.eup %327 }
  0xe5   :  { %v131_v39 = vadd.f32 1.0, %v328_v37 }
  0xe6   :  { %v330_v38 = vpop.eup %329 }
  0xe7   :  { %v130_v41 = vadd.f32 1.0, %v330_v38  ;;  %v133_v44 = vmul.f32 %v131_v39, %v117_v42 }
  0xe9   :  { %v132_v43 = vmul.f32 %v130_v41, %v116_v40 }
  0xeb   :  { %321 = vmatprep.mubr.f32.mxu1 %v132_v43 }
  0xec   :  { %322 = vmatmul.mubr.f32.vlgmr.msra.gmra.mxu1 %v133_v44 }
 0x1ac   :  { %v323_v46 = vpop.f32.mrf.mxu1 }
 0x1ad   :  { %v229_v47 = vadd.f32 %v323_v46, %v253_v45 }
 0x1ae   :  { %v223_v48 = vpop.f32.mrf.mxu1 }
 0x1af   :  { %233 = vst.msk [vmem:[#allocation2 + $0x8] sm:$0xff] %vm34_vm0, %v229_v47  ;;  %v224_v49 = vadd.f32 %v253_v45, %v223_v48 }
 0x1b1   :  { %232 = vst.msk [vmem:[#allocation2] sm:$0xff] %vm34_vm0, %v224_v49 }
 0x1b2   :  { %342 = shalt.err (!%p339_p4)
}
 0x1b3   :  { %s354_s13 = smov 128   ;;  %s355_s4 = smov 8  }
 0x1b4   :  { %245 = dma.vmem_to_hbm [thread:$0]  %s240_s11, 256, %s470_s5, [#allocation3], %s354_s13, %s354_s13, %s355_s4  }
 0x1b5   :  { %351 = dma.done.wait [#allocation3], 256  }
 0x1b6   :  { %352 = vsyncadd [#allocation3], 4294967040 }
 0x1b7   :  { %249 = vsyncpa [#allocation3], 1 }

</bundles_post_ra>
